<compile_context>
chip_gen: v7x
topology: tpu7x:2x2x1
jax: 0.10.0
libtpu: 0.0.40
codegen_flags: <defaults>
</compile_context>

<pallas_src>
import functools

import jax
import jax.numpy as jnp
from jax.experimental import pallas as pl
from jax.experimental.pallas import tpu as pltpu

EPS = 1e-5  # nn.LayerNorm default eps

# Row indices into the packed (16, 128) parameter-vector slab.
LN0_G, LN0_B = 0, 1
B1, LN1_G, LN1_B = 2, 3, 4
B2, LN2_G, LN2_B = 5, 6, 7
B3, LN3_G, LN3_B = 8, 9, 10
CB1, CLN_G, CLN_B = 11, 12, 13
CB2 = 14
N_VEC_ROWS = 16        # padded to a multiple of 8 sublanes
VEC_LANES = 128        # one full vreg lane width
OUT_LANES = 128        # lane-dense output slab width


def _layer_norm(x, gamma, beta):
    mu = jnp.mean(x, axis=-1, keepdims=True)
    d = x - mu
    var = jnp.mean(d * d, axis=-1, keepdims=True)
    return d * jax.lax.rsqrt(var + EPS) * gamma + beta


def graphnet_kernel(
    # inputs (one graph per grid step; leading graph dim squeezed by BlockSpec)
    x_ref, adj_ref, vec_ref,
    w1_ref, w2_ref, w3_ref, cw1_ref, cw2_ref,
    # output
    out_ref,
    *, c_in, hidden, h2, nc,
):
    n = x_ref.shape[0]
    x = x_ref[...]          # (N, C) f32
    adj = adj_ref[...]      # (N, N) bf16

    def vec(row, width):    # packed (1, width) parameter vector, f32
        return vec_ref[row:row + 1, :width]

    def graph_conv(h, w_fused_ref, b_row, f_out):
        # one bf16 cast per block, reused for aggregation and rel/root matmul
        h_bf16 = h.astype(jnp.bfloat16)
        # neighbor aggregation (incoming edges): A @ h  — MXU bf16, f32 accum
        agg = jnp.dot(adj, h_bf16, preferred_element_type=jnp.float32)
        # fused rel/root matmul: [agg | h] @ [W_rel^T ; W_root^T], concat in regs
        cat = jnp.concatenate([agg.astype(jnp.bfloat16), h_bf16], axis=-1)
        return (jnp.dot(cat, w_fused_ref[...],
                        preferred_element_type=jnp.float32)
                + vec(b_row, f_out))

    # bn_0 (LayerNorm over features) + ReLU — f32 VPU math
    xn = jnp.maximum(_layer_norm(x, vec(LN0_G, c_in), vec(LN0_B, c_in)), 0.0)

    # block 1: h = ln_1(x + relu(gcn_1(x)))
    g1 = graph_conv(xn, w1_ref, B1, c_in)
    h = _layer_norm(xn + jnp.maximum(g1, 0.0),
                    vec(LN1_G, c_in), vec(LN1_B, c_in))
    # block 2: h = ln_2(h + relu(gcn_2(h)))
    g2 = graph_conv(h, w2_ref, B2, c_in)
    h = _layer_norm(h + jnp.maximum(g2, 0.0),
                    vec(LN2_G, c_in), vec(LN2_B, c_in))
    # block 3: h = ln_3(relu(gcn_3(h)))
    g3 = graph_conv(h, w3_ref, B3, hidden)
    h = _layer_norm(jnp.maximum(g3, 0.0),
                    vec(LN3_G, hidden), vec(LN3_B, hidden))

    # classifier: Dropout (eval: identity) -> Linear -> ReLU -> LayerNorm -> Linear
    z = (jnp.dot(h.astype(jnp.bfloat16), cw1_ref[...],
                 preferred_element_type=jnp.float32) + vec(CB1, h2))
    z = jnp.maximum(z, 0.0)
    z = _layer_norm(z, vec(CLN_G, h2), vec(CLN_B, h2))
    logits = (jnp.dot(z.astype(jnp.bfloat16), cw2_ref[...],
                      preferred_element_type=jnp.float32) + vec(CB2, nc))

    # log_softmax over class dim (dim=1 per node)
    m = jnp.max(logits, axis=-1, keepdims=True)
    s = logits - m
    lse = jnp.log(jnp.sum(jnp.exp(s), axis=-1, keepdims=True))
    logp = s - lse

    # single lane-dense (N, 128) store: [h | log_probs | zero pad]
    pad = jnp.zeros((n, OUT_LANES - hidden - nc), jnp.float32)
    out_ref[...] = jnp.concatenate([h, logp, pad], axis=-1)


def graphnet_forward(x, adj, params, *, c_in, hidden, nc):
    """x: (B, N, c_in) f32, adj: (B, N, N) — B independent graphs per call."""
    b, n, _ = x.shape
    h2 = hidden // 2
    vec_pack, w1, w2, w3, cw1, cw2 = params

    kernel = functools.partial(graphnet_kernel,
                               c_in=c_in, hidden=hidden, h2=h2, nc=nc)

    flops = b * (3 * 2 * n * n * c_in                     # three A @ h aggregations
                 + 2 * (2 * n * (2 * c_in) * c_in)        # fused conv 1 & 2
                 + 2 * n * (2 * c_in) * hidden            # fused conv 3
                 + 2 * n * hidden * h2 + 2 * n * h2 * nc)  # classifier
    transcendentals = b * (5 * n + n * nc + n)            # rsqrt (5 LN) + exp + log
    bytes_accessed = (int(x.size) * 4 + int(adj.size) * 2
                      + int(vec_pack.size) * 4
                      + sum(int(w.size) * 2 for w in (w1, w2, w3, cw1, cw2))
                      + b * n * OUT_LANES * 4)
    cost = pl.CostEstimate(flops=flops, transcendentals=transcendentals,
                           bytes_accessed=bytes_accessed)

    def resident(shape):
        # tiny weight / param slabs: constant index_map -> pinned in VMEM across grid
        return pl.BlockSpec(shape, lambda g: tuple(0 for _ in shape))

    out = pl.pallas_call(
        kernel,
        out_shape=jax.ShapeDtypeStruct((b, n, OUT_LANES), jnp.float32),
        grid=(b,),
        in_specs=[
            pl.BlockSpec((None, n, c_in), lambda g: (g, 0, 0)),     # x (per graph)
            pl.BlockSpec((None, n, n), lambda g: (g, 0, 0)),        # adj (per graph)
            resident(vec_pack.shape),
            resident(w1.shape), resident(w2.shape), resident(w3.shape),
            resident(cw1.shape), resident(cw2.shape),
        ],
        out_specs=pl.BlockSpec((None, n, OUT_LANES), lambda g: (g, 0, 0)),
        compiler_params=pltpu.CompilerParams(
            dimension_semantics=("parallel",)),
        cost_estimate=cost,
    )(x.astype(jnp.float32), adj.astype(jnp.bfloat16), vec_pack,
      w1, w2, w3, cw1, cw2)

    h_out = out[:, :, :hidden]
    logits = out[:, :, hidden:hidden + nc]
    return logits, h_out


def make_params(key, c_in, hidden, nc):
    """Deterministic synthetic parameters, pre-packed for the kernel:
       - fused GraphConv weights [W_rel^T ; W_root^T] as (2*fin, fout) bf16
       - classifier weights pre-transposed (fin, fout) bf16
       - all 1-D vectors (LN gammas/betas, biases) packed into one (16,128) f32 slab."""
    h2 = hidden // 2
    keys = jax.random.split(key, 8)

    def lin_w(k, fin, fout):
        return (jax.random.normal(k, (fin, fout), jnp.float32)
                * (1.0 / jnp.sqrt(jnp.float32(fin))))

    w1 = jnp.concatenate([lin_w(keys[0], c_in, c_in),
                          lin_w(keys[1], c_in, c_in)], axis=0)
    w2 = jnp.concatenate([lin_w(keys[2], c_in, c_in),
                          lin_w(keys[3], c_in, c_in)], axis=0)
    w3 = jnp.concatenate([lin_w(keys[4], c_in, hidden),
                          lin_w(keys[5], c_in, hidden)], axis=0)
    cw1 = lin_w(keys[6], hidden, h2)
    cw2 = lin_w(keys[7], h2, nc)

    vec_pack = jnp.zeros((N_VEC_ROWS, VEC_LANES), jnp.float32)

    def put(vp, row, v):
        return vp.at[row, :v.shape[0]].set(v.astype(jnp.float32))

    vec_pack = put(vec_pack, LN0_G, jnp.ones((c_in,)))
    vec_pack = put(vec_pack, LN0_B, jnp.zeros((c_in,)))
    vec_pack = put(vec_pack, B1, jnp.zeros((c_in,)))
    vec_pack = put(vec_pack, LN1_G, jnp.ones((c_in,)))
    vec_pack = put(vec_pack, LN1_B, jnp.zeros((c_in,)))
    vec_pack = put(vec_pack, B2, jnp.zeros((c_in,)))
    vec_pack = put(vec_pack, LN2_G, jnp.ones((c_in,)))
    vec_pack = put(vec_pack, LN2_B, jnp.zeros((c_in,)))
    vec_pack = put(vec_pack, B3, jnp.zeros((hidden,)))
    vec_pack = put(vec_pack, LN3_G, jnp.ones((hidden,)))
    vec_pack = put(vec_pack, LN3_B, jnp.zeros((hidden,)))
    vec_pack = put(vec_pack, CB1, jnp.zeros((h2,)))
    vec_pack = put(vec_pack, CLN_G, jnp.ones((h2,)))
    vec_pack = put(vec_pack, CLN_B, jnp.zeros((h2,)))
    vec_pack = put(vec_pack, CB2, jnp.zeros((nc,)))

    return (vec_pack,
            w1.astype(jnp.bfloat16), w2.astype(jnp.bfloat16),
            w3.astype(jnp.bfloat16),
            cw1.astype(jnp.bfloat16), cw2.astype(jnp.bfloat16))


if __name__ == "__main__":
    B = 8           # graphs per pallas_call (grid axis, "parallel")
    N = 16          # nodes per graph
    C_IN = 32       # input feature dim
    HIDDEN = 32     # hidden_size
    NC = 8          # number of classes

    key = jax.random.PRNGKey(0)
    kx, ka, kp = jax.random.split(key, 3)

    x = jax.random.normal(kx, (B, N, C_IN), jnp.float32)

    # Deterministic random graphs: dense adjacency A[g, dst, src] = 1 for src->dst,
    # no self loops (GraphConv handles the root node via W_root).
    adj = (jax.random.uniform(ka, (B, N, N)) < 0.3).astype(jnp.float32)
    adj = adj * (1.0 - jnp.eye(N, dtype=jnp.float32))[None]

    params = make_params(kp, C_IN, HIDDEN, NC)

    logits, h = graphnet_forward(x, adj, params, c_in=C_IN, hidden=HIDDEN, nc=NC)
    jax.block_until_ready((logits, h))

    assert logits.shape == (B, N, NC) and h.shape == (B, N, HIDDEN)
    # log_softmax rows should sum to ~1 in prob space
    assert jnp.allclose(jnp.sum(jnp.exp(logits), axis=-1), 1.0, atol=1e-4)
    print("KERNEL_OK")
</pallas_src>

<mosaic_0001>
module attributes {stable_mosaic.version = 11 : i64} {
  func.func @graphnet_kernel(%arg0: i32, %arg1: memref<1x16x32xf32, #tpu.memory_space<vmem>>, %arg2: memref<1x16x16xbf16, #tpu.memory_space<vmem>>, %arg3: memref<16x128xf32, #tpu.memory_space<vmem>>, %arg4: memref<64x32xbf16, #tpu.memory_space<vmem>>, %arg5: memref<64x32xbf16, #tpu.memory_space<vmem>>, %arg6: memref<64x32xbf16, #tpu.memory_space<vmem>>, %arg7: memref<32x16xbf16, #tpu.memory_space<vmem>>, %arg8: memref<16x8xbf16, #tpu.memory_space<vmem>>, %arg9: memref<1x16x128xf32, #tpu.memory_space<vmem>>) attributes {dimension_semantics = [#tpu.dimension_semantics<parallel>], iteration_bounds = array<i64: 8>, scalar_prefetch = 0 : i64, scratch_operands = 0 : i64, tpu.core_type = #tpu.core_type<tc>, window_params = [{transform_indices = @transform_0, window_bounds = array<i64: 1, 16, 32>}, {transform_indices = @transform_1, window_bounds = array<i64: 1, 16, 16>}, {pipeline_mode = #tpu.pipeline_mode<synchronous>, transform_indices = @transform_2, window_bounds = array<i64: 16, 128>}, {pipeline_mode = #tpu.pipeline_mode<synchronous>, transform_indices = @transform_3, window_bounds = array<i64: 64, 32>}, {pipeline_mode = #tpu.pipeline_mode<synchronous>, transform_indices = @transform_4, window_bounds = array<i64: 64, 32>}, {pipeline_mode = #tpu.pipeline_mode<synchronous>, transform_indices = @transform_5, window_bounds = array<i64: 64, 32>}, {pipeline_mode = #tpu.pipeline_mode<synchronous>, transform_indices = @transform_6, window_bounds = array<i64: 32, 16>}, {pipeline_mode = #tpu.pipeline_mode<synchronous>, transform_indices = @transform_7, window_bounds = array<i64: 16, 8>}, {transform_indices = @transform_8, window_bounds = array<i64: 1, 16, 128>}]} {
    %c0 = arith.constant 0 : index
    %c0_0 = arith.constant 0 : index
    %c0_1 = arith.constant 0 : index
    %0 = vector.load %arg1[%c0, %c0_0, %c0_1] : memref<1x16x32xf32, #tpu.memory_space<vmem>>, vector<1x16x32xf32>
    %1 = vector.shape_cast %0 : vector<1x16x32xf32> to vector<16x32xf32>
    %c0_2 = arith.constant 0 : index
    %c0_3 = arith.constant 0 : index
    %c0_4 = arith.constant 0 : index
    %2 = vector.load %arg2[%c0_2, %c0_3, %c0_4] : memref<1x16x16xbf16, #tpu.memory_space<vmem>>, vector<1x16x16xbf16>
    %3 = vector.shape_cast %2 : vector<1x16x16xbf16> to vector<16x16xbf16>
    %c0_5 = arith.constant 0 : index
    %c0_6 = arith.constant 0 : index
    %4 = vector.load %arg3[%c0_5, %c0_6] : memref<16x128xf32, #tpu.memory_space<vmem>>, vector<1x32xf32>
    %c1 = arith.constant 1 : index
    %c0_7 = arith.constant 0 : index
    %5 = vector.load %arg3[%c1, %c0_7] : memref<16x128xf32, #tpu.memory_space<vmem>>, vector<1x32xf32>
    %cst = arith.constant dense<0.000000e+00> : vector<16xf32>
    %6 = vector.multi_reduction <add>, %1, %cst [1] : vector<16x32xf32> to vector<16xf32>
    %7 = vector.shape_cast %6 : vector<16xf32> to vector<16x1xf32>
    %cst_8 = arith.constant 3.200000e+01 : f32
    %8 = vector.broadcast %cst_8 : f32 to vector<16x1xf32>
    %9 = arith.divf %7, %8 : vector<16x1xf32>
    %10 = vector.broadcast %9 : vector<16x1xf32> to vector<16x32xf32>
    %11 = arith.subf %1, %10 : vector<16x32xf32>
    %12 = arith.mulf %11, %11 : vector<16x32xf32>
    %cst_9 = arith.constant dense<0.000000e+00> : vector<16xf32>
    %13 = vector.multi_reduction <add>, %12, %cst_9 [1] : vector<16x32xf32> to vector<16xf32>
    %14 = vector.shape_cast %13 : vector<16xf32> to vector<16x1xf32>
    %cst_10 = arith.constant 3.200000e+01 : f32
    %15 = vector.broadcast %cst_10 : f32 to vector<16x1xf32>
    %16 = arith.divf %14, %15 : vector<16x1xf32>
    %cst_11 = arith.constant 9.99999974E-6 : f32
    %17 = vector.broadcast %cst_11 : f32 to vector<16x1xf32>
    %18 = arith.addf %16, %17 : vector<16x1xf32>
    %19 = math.rsqrt %18 : vector<16x1xf32>
    %20 = vector.broadcast %19 : vector<16x1xf32> to vector<16x32xf32>
    %21 = arith.mulf %11, %20 : vector<16x32xf32>
    %22 = vector.broadcast %4 : vector<1x32xf32> to vector<16x32xf32>
    %23 = arith.mulf %21, %22 : vector<16x32xf32>
    %24 = vector.broadcast %5 : vector<1x32xf32> to vector<16x32xf32>
    %25 = arith.addf %23, %24 : vector<16x32xf32>
    %cst_12 = arith.constant 0.000000e+00 : f32
    %26 = vector.broadcast %cst_12 : f32 to vector<16x32xf32>
    %27 = arith.maximumf %25, %26 : vector<16x32xf32>
    %28 = arith.truncf %27 : vector<16x32xf32> to vector<16x32xbf16>
    %cst_13 = arith.constant dense<0.000000e+00> : vector<16x32xf32>
    %29 = tpu.matmul %3, %28, %cst_13 {dimension_numbers = #tpu.dot_dimension_numbers<[1], [0], [0], [1], [0, 0, 1, 1], [], []>} : vector<16x16xbf16>, vector<16x32xbf16>, vector<16x32xf32> -> vector<16x32xf32>
    %30 = arith.truncf %29 : vector<16x32xf32> to vector<16x32xbf16>
    %31 = tpu.concatenate %30, %28 in 1 : vector<16x32xbf16>, vector<16x32xbf16> -> vector<16x64xbf16>
    %c0_14 = arith.constant 0 : index
    %c0_15 = arith.constant 0 : index
    %32 = vector.load %arg4[%c0_14, %c0_15] : memref<64x32xbf16, #tpu.memory_space<vmem>>, vector<64x32xbf16>
    %cst_16 = arith.constant dense<0.000000e+00> : vector<16x32xf32>
    %33 = tpu.matmul %31, %32, %cst_16 {dimension_numbers = #tpu.dot_dimension_numbers<[1], [0], [0], [1], [0, 0, 1, 1], [], []>} : vector<16x64xbf16>, vector<64x32xbf16>, vector<16x32xf32> -> vector<16x32xf32>
    %c2 = arith.constant 2 : index
    %c0_17 = arith.constant 0 : index
    %34 = vector.load %arg3[%c2, %c0_17] : memref<16x128xf32, #tpu.memory_space<vmem>>, vector<1x32xf32>
    %35 = vector.broadcast %34 : vector<1x32xf32> to vector<16x32xf32>
    %36 = arith.addf %33, %35 : vector<16x32xf32>
    %cst_18 = arith.constant 0.000000e+00 : f32
    %37 = vector.broadcast %cst_18 : f32 to vector<16x32xf32>
    %38 = arith.maximumf %36, %37 : vector<16x32xf32>
    %39 = arith.addf %27, %38 : vector<16x32xf32>
    %c3 = arith.constant 3 : index
    %c0_19 = arith.constant 0 : index
    %40 = vector.load %arg3[%c3, %c0_19] : memref<16x128xf32, #tpu.memory_space<vmem>>, vector<1x32xf32>
    %c4 = arith.constant 4 : index
    %c0_20 = arith.constant 0 : index
    %41 = vector.load %arg3[%c4, %c0_20] : memref<16x128xf32, #tpu.memory_space<vmem>>, vector<1x32xf32>
    %cst_21 = arith.constant dense<0.000000e+00> : vector<16xf32>
    %42 = vector.multi_reduction <add>, %39, %cst_21 [1] : vector<16x32xf32> to vector<16xf32>
    %43 = vector.shape_cast %42 : vector<16xf32> to vector<16x1xf32>
    %cst_22 = arith.constant 3.200000e+01 : f32
    %44 = vector.broadcast %cst_22 : f32 to vector<16x1xf32>
    %45 = arith.divf %43, %44 : vector<16x1xf32>
    %46 = vector.broadcast %45 : vector<16x1xf32> to vector<16x32xf32>
    %47 = arith.subf %39, %46 : vector<16x32xf32>
    %48 = arith.mulf %47, %47 : vector<16x32xf32>
    %cst_23 = arith.constant dense<0.000000e+00> : vector<16xf32>
    %49 = vector.multi_reduction <add>, %48, %cst_23 [1] : vector<16x32xf32> to vector<16xf32>
    %50 = vector.shape_cast %49 : vector<16xf32> to vector<16x1xf32>
    %cst_24 = arith.constant 3.200000e+01 : f32
    %51 = vector.broadcast %cst_24 : f32 to vector<16x1xf32>
    %52 = arith.divf %50, %51 : vector<16x1xf32>
    %cst_25 = arith.constant 9.99999974E-6 : f32
    %53 = vector.broadcast %cst_25 : f32 to vector<16x1xf32>
    %54 = arith.addf %52, %53 : vector<16x1xf32>
    %55 = math.rsqrt %54 : vector<16x1xf32>
    %56 = vector.broadcast %55 : vector<16x1xf32> to vector<16x32xf32>
    %57 = arith.mulf %47, %56 : vector<16x32xf32>
    %58 = vector.broadcast %40 : vector<1x32xf32> to vector<16x32xf32>
    %59 = arith.mulf %57, %58 : vector<16x32xf32>
    %60 = vector.broadcast %41 : vector<1x32xf32> to vector<16x32xf32>
    %61 = arith.addf %59, %60 : vector<16x32xf32>
    %62 = arith.truncf %61 : vector<16x32xf32> to vector<16x32xbf16>
    %cst_26 = arith.constant dense<0.000000e+00> : vector<16x32xf32>
    %63 = tpu.matmul %3, %62, %cst_26 {dimension_numbers = #tpu.dot_dimension_numbers<[1], [0], [0], [1], [0, 0, 1, 1], [], []>} : vector<16x16xbf16>, vector<16x32xbf16>, vector<16x32xf32> -> vector<16x32xf32>
    %64 = arith.truncf %63 : vector<16x32xf32> to vector<16x32xbf16>
    %65 = tpu.concatenate %64, %62 in 1 : vector<16x32xbf16>, vector<16x32xbf16> -> vector<16x64xbf16>
    %c0_27 = arith.constant 0 : index
    %c0_28 = arith.constant 0 : index
    %66 = vector.load %arg5[%c0_27, %c0_28] : memref<64x32xbf16, #tpu.memory_space<vmem>>, vector<64x32xbf16>
    %cst_29 = arith.constant dense<0.000000e+00> : vector<16x32xf32>
    %67 = tpu.matmul %65, %66, %cst_29 {dimension_numbers = #tpu.dot_dimension_numbers<[1], [0], [0], [1], [0, 0, 1, 1], [], []>} : vector<16x64xbf16>, vector<64x32xbf16>, vector<16x32xf32> -> vector<16x32xf32>
    %c5 = arith.constant 5 : index
    %c0_30 = arith.constant 0 : index
    %68 = vector.load %arg3[%c5, %c0_30] : memref<16x128xf32, #tpu.memory_space<vmem>>, vector<1x32xf32>
    %69 = vector.broadcast %68 : vector<1x32xf32> to vector<16x32xf32>
    %70 = arith.addf %67, %69 : vector<16x32xf32>
    %cst_31 = arith.constant 0.000000e+00 : f32
    %71 = vector.broadcast %cst_31 : f32 to vector<16x32xf32>
    %72 = arith.maximumf %70, %71 : vector<16x32xf32>
    %73 = arith.addf %61, %72 : vector<16x32xf32>
    %c6 = arith.constant 6 : index
    %c0_32 = arith.constant 0 : index
    %74 = vector.load %arg3[%c6, %c0_32] : memref<16x128xf32, #tpu.memory_space<vmem>>, vector<1x32xf32>
    %c7 = arith.constant 7 : index
    %c0_33 = arith.constant 0 : index
    %75 = vector.load %arg3[%c7, %c0_33] : memref<16x128xf32, #tpu.memory_space<vmem>>, vector<1x32xf32>
    %cst_34 = arith.constant dense<0.000000e+00> : vector<16xf32>
    %76 = vector.multi_reduction <add>, %73, %cst_34 [1] : vector<16x32xf32> to vector<16xf32>
    %77 = vector.shape_cast %76 : vector<16xf32> to vector<16x1xf32>
    %cst_35 = arith.constant 3.200000e+01 : f32
    %78 = vector.broadcast %cst_35 : f32 to vector<16x1xf32>
    %79 = arith.divf %77, %78 : vector<16x1xf32>
    %80 = vector.broadcast %79 : vector<16x1xf32> to vector<16x32xf32>
    %81 = arith.subf %73, %80 : vector<16x32xf32>
    %82 = arith.mulf %81, %81 : vector<16x32xf32>
    %cst_36 = arith.constant dense<0.000000e+00> : vector<16xf32>
    %83 = vector.multi_reduction <add>, %82, %cst_36 [1] : vector<16x32xf32> to vector<16xf32>
    %84 = vector.shape_cast %83 : vector<16xf32> to vector<16x1xf32>
    %cst_37 = arith.constant 3.200000e+01 : f32
    %85 = vector.broadcast %cst_37 : f32 to vector<16x1xf32>
    %86 = arith.divf %84, %85 : vector<16x1xf32>
    %cst_38 = arith.constant 9.99999974E-6 : f32
    %87 = vector.broadcast %cst_38 : f32 to vector<16x1xf32>
    %88 = arith.addf %86, %87 : vector<16x1xf32>
    %89 = math.rsqrt %88 : vector<16x1xf32>
    %90 = vector.broadcast %89 : vector<16x1xf32> to vector<16x32xf32>
    %91 = arith.mulf %81, %90 : vector<16x32xf32>
    %92 = vector.broadcast %74 : vector<1x32xf32> to vector<16x32xf32>
    %93 = arith.mulf %91, %92 : vector<16x32xf32>
    %94 = vector.broadcast %75 : vector<1x32xf32> to vector<16x32xf32>
    %95 = arith.addf %93, %94 : vector<16x32xf32>
    %96 = arith.truncf %95 : vector<16x32xf32> to vector<16x32xbf16>
    %cst_39 = arith.constant dense<0.000000e+00> : vector<16x32xf32>
    %97 = tpu.matmul %3, %96, %cst_39 {dimension_numbers = #tpu.dot_dimension_numbers<[1], [0], [0], [1], [0, 0, 1, 1], [], []>} : vector<16x16xbf16>, vector<16x32xbf16>, vector<16x32xf32> -> vector<16x32xf32>
    %98 = arith.truncf %97 : vector<16x32xf32> to vector<16x32xbf16>
    %99 = tpu.concatenate %98, %96 in 1 : vector<16x32xbf16>, vector<16x32xbf16> -> vector<16x64xbf16>
    %c0_40 = arith.constant 0 : index
    %c0_41 = arith.constant 0 : index
    %100 = vector.load %arg6[%c0_40, %c0_41] : memref<64x32xbf16, #tpu.memory_space<vmem>>, vector<64x32xbf16>
    %cst_42 = arith.constant dense<0.000000e+00> : vector<16x32xf32>
    %101 = tpu.matmul %99, %100, %cst_42 {dimension_numbers = #tpu.dot_dimension_numbers<[1], [0], [0], [1], [0, 0, 1, 1], [], []>} : vector<16x64xbf16>, vector<64x32xbf16>, vector<16x32xf32> -> vector<16x32xf32>
    %c8 = arith.constant 8 : index
    %c0_43 = arith.constant 0 : index
    %102 = vector.load %arg3[%c8, %c0_43] : memref<16x128xf32, #tpu.memory_space<vmem>>, vector<1x32xf32>
    %103 = vector.broadcast %102 : vector<1x32xf32> to vector<16x32xf32>
    %104 = arith.addf %101, %103 : vector<16x32xf32>
    %cst_44 = arith.constant 0.000000e+00 : f32
    %105 = vector.broadcast %cst_44 : f32 to vector<16x32xf32>
    %106 = arith.maximumf %104, %105 : vector<16x32xf32>
    %c9 = arith.constant 9 : index
    %c0_45 = arith.constant 0 : index
    %107 = vector.load %arg3[%c9, %c0_45] : memref<16x128xf32, #tpu.memory_space<vmem>>, vector<1x32xf32>
    %c10 = arith.constant 10 : index
    %c0_46 = arith.constant 0 : index
    %108 = vector.load %arg3[%c10, %c0_46] : memref<16x128xf32, #tpu.memory_space<vmem>>, vector<1x32xf32>
    %cst_47 = arith.constant dense<0.000000e+00> : vector<16xf32>
    %109 = vector.multi_reduction <add>, %106, %cst_47 [1] : vector<16x32xf32> to vector<16xf32>
    %110 = vector.shape_cast %109 : vector<16xf32> to vector<16x1xf32>
    %cst_48 = arith.constant 3.200000e+01 : f32
    %111 = vector.broadcast %cst_48 : f32 to vector<16x1xf32>
    %112 = arith.divf %110, %111 : vector<16x1xf32>
    %113 = vector.broadcast %112 : vector<16x1xf32> to vector<16x32xf32>
    %114 = arith.subf %106, %113 : vector<16x32xf32>
    %115 = arith.mulf %114, %114 : vector<16x32xf32>
    %cst_49 = arith.constant dense<0.000000e+00> : vector<16xf32>
    %116 = vector.multi_reduction <add>, %115, %cst_49 [1] : vector<16x32xf32> to vector<16xf32>
    %117 = vector.shape_cast %116 : vector<16xf32> to vector<16x1xf32>
    %cst_50 = arith.constant 3.200000e+01 : f32
    %118 = vector.broadcast %cst_50 : f32 to vector<16x1xf32>
    %119 = arith.divf %117, %118 : vector<16x1xf32>
    %cst_51 = arith.constant 9.99999974E-6 : f32
    %120 = vector.broadcast %cst_51 : f32 to vector<16x1xf32>
    %121 = arith.addf %119, %120 : vector<16x1xf32>
    %122 = math.rsqrt %121 : vector<16x1xf32>
    %123 = vector.broadcast %122 : vector<16x1xf32> to vector<16x32xf32>
    %124 = arith.mulf %114, %123 : vector<16x32xf32>
    %125 = vector.broadcast %107 : vector<1x32xf32> to vector<16x32xf32>
    %126 = arith.mulf %124, %125 : vector<16x32xf32>
    %127 = vector.broadcast %108 : vector<1x32xf32> to vector<16x32xf32>
    %128 = arith.addf %126, %127 : vector<16x32xf32>
    %129 = arith.truncf %128 : vector<16x32xf32> to vector<16x32xbf16>
    %c0_52 = arith.constant 0 : index
    %c0_53 = arith.constant 0 : index
    %130 = vector.load %arg7[%c0_52, %c0_53] : memref<32x16xbf16, #tpu.memory_space<vmem>>, vector<32x16xbf16>
    %cst_54 = arith.constant dense<0.000000e+00> : vector<16x16xf32>
    %131 = tpu.matmul %129, %130, %cst_54 {dimension_numbers = #tpu.dot_dimension_numbers<[1], [0], [0], [1], [0, 0, 1, 1], [], []>} : vector<16x32xbf16>, vector<32x16xbf16>, vector<16x16xf32> -> vector<16x16xf32>
    %c11 = arith.constant 11 : index
    %c0_55 = arith.constant 0 : index
    %132 = vector.load %arg3[%c11, %c0_55] : memref<16x128xf32, #tpu.memory_space<vmem>>, vector<1x16xf32>
    %133 = vector.broadcast %132 : vector<1x16xf32> to vector<16x16xf32>
    %134 = arith.addf %131, %133 : vector<16x16xf32>
    %cst_56 = arith.constant 0.000000e+00 : f32
    %135 = vector.broadcast %cst_56 : f32 to vector<16x16xf32>
    %136 = arith.maximumf %134, %135 : vector<16x16xf32>
    %c12 = arith.constant 12 : index
    %c0_57 = arith.constant 0 : index
    %137 = vector.load %arg3[%c12, %c0_57] : memref<16x128xf32, #tpu.memory_space<vmem>>, vector<1x16xf32>
    %c13 = arith.constant 13 : index
    %c0_58 = arith.constant 0 : index
    %138 = vector.load %arg3[%c13, %c0_58] : memref<16x128xf32, #tpu.memory_space<vmem>>, vector<1x16xf32>
    %cst_59 = arith.constant dense<0.000000e+00> : vector<16xf32>
    %139 = vector.multi_reduction <add>, %136, %cst_59 [1] : vector<16x16xf32> to vector<16xf32>
    %140 = vector.shape_cast %139 : vector<16xf32> to vector<16x1xf32>
    %cst_60 = arith.constant 1.600000e+01 : f32
    %141 = vector.broadcast %cst_60 : f32 to vector<16x1xf32>
    %142 = arith.divf %140, %141 : vector<16x1xf32>
    %143 = vector.broadcast %142 : vector<16x1xf32> to vector<16x16xf32>
    %144 = arith.subf %136, %143 : vector<16x16xf32>
    %145 = arith.mulf %144, %144 : vector<16x16xf32>
    %cst_61 = arith.constant dense<0.000000e+00> : vector<16xf32>
    %146 = vector.multi_reduction <add>, %145, %cst_61 [1] : vector<16x16xf32> to vector<16xf32>
    %147 = vector.shape_cast %146 : vector<16xf32> to vector<16x1xf32>
    %cst_62 = arith.constant 1.600000e+01 : f32
    %148 = vector.broadcast %cst_62 : f32 to vector<16x1xf32>
    %149 = arith.divf %147, %148 : vector<16x1xf32>
    %cst_63 = arith.constant 9.99999974E-6 : f32
    %150 = vector.broadcast %cst_63 : f32 to vector<16x1xf32>
    %151 = arith.addf %149, %150 : vector<16x1xf32>
    %152 = math.rsqrt %151 : vector<16x1xf32>
    %153 = vector.broadcast %152 : vector<16x1xf32> to vector<16x16xf32>
    %154 = arith.mulf %144, %153 : vector<16x16xf32>
    %155 = vector.broadcast %137 : vector<1x16xf32> to vector<16x16xf32>
    %156 = arith.mulf %154, %155 : vector<16x16xf32>
    %157 = vector.broadcast %138 : vector<1x16xf32> to vector<16x16xf32>
    %158 = arith.addf %156, %157 : vector<16x16xf32>
    %159 = arith.truncf %158 : vector<16x16xf32> to vector<16x16xbf16>
    %c0_64 = arith.constant 0 : index
    %c0_65 = arith.constant 0 : index
    %160 = vector.load %arg8[%c0_64, %c0_65] : memref<16x8xbf16, #tpu.memory_space<vmem>>, vector<16x8xbf16>
    %cst_66 = arith.constant dense<0.000000e+00> : vector<16x8xf32>
    %161 = tpu.matmul %159, %160, %cst_66 {dimension_numbers = #tpu.dot_dimension_numbers<[1], [0], [0], [1], [0, 0, 1, 1], [], []>} : vector<16x16xbf16>, vector<16x8xbf16>, vector<16x8xf32> -> vector<16x8xf32>
    %c14 = arith.constant 14 : index
    %c0_67 = arith.constant 0 : index
    %162 = vector.load %arg3[%c14, %c0_67] : memref<16x128xf32, #tpu.memory_space<vmem>>, vector<1x8xf32>
    %163 = vector.broadcast %162 : vector<1x8xf32> to vector<16x8xf32>
    %164 = arith.addf %161, %163 : vector<16x8xf32>
    %cst_68 = arith.constant dense<0xFF800000> : vector<16xf32>
    %165 = vector.multi_reduction <maximumf>, %164, %cst_68 [1] : vector<16x8xf32> to vector<16xf32>
    %166 = vector.shape_cast %165 : vector<16xf32> to vector<16x1xf32>
    %167 = vector.broadcast %166 : vector<16x1xf32> to vector<16x8xf32>
    %168 = arith.subf %164, %167 : vector<16x8xf32>
    %169 = math.exp %168 : vector<16x8xf32>
    %cst_69 = arith.constant dense<0.000000e+00> : vector<16xf32>
    %170 = vector.multi_reduction <add>, %169, %cst_69 [1] : vector<16x8xf32> to vector<16xf32>
    %171 = vector.shape_cast %170 : vector<16xf32> to vector<16x1xf32>
    %172 = math.log %171 : vector<16x1xf32>
    %173 = vector.broadcast %172 : vector<16x1xf32> to vector<16x8xf32>
    %174 = arith.subf %168, %173 : vector<16x8xf32>
    %cst_70 = arith.constant 0.000000e+00 : f32
    %175 = vector.broadcast %cst_70 : f32 to vector<16x88xf32>
    %176 = tpu.concatenate %128, %174, %175 in 1 : vector<16x32xf32>, vector<16x8xf32>, vector<16x88xf32> -> vector<16x128xf32>
    %c0_71 = arith.constant 0 : index
    %c0_72 = arith.constant 0 : index
    %c0_73 = arith.constant 0 : index
    %177 = vector.load %arg9[%c0_71, %c0_72, %c0_73] : memref<1x16x128xf32, #tpu.memory_space<vmem>>, vector<1x16x128xf32>
    %178 = vector.shape_cast %177 : vector<1x16x128xf32> to vector<16x128xf32>
    %179 = vector.shape_cast %176 : vector<16x128xf32> to vector<1x16x128xf32>
    tpu.vector_store %arg9[%c0_71, %c0_72, %c0_73], %179 {strides = array<i32>} : memref<1x16x128xf32, #tpu.memory_space<vmem>>, vector<1x16x128xf32>,
    return
  }
  func.func @transform_0(%arg0: i32) -> (i32, i32, i32) {
    %c0_i32 = arith.constant 0 : i32
    %c0_i32_0 = arith.constant 0 : i32
    %c0_i32_1 = arith.constant 0 : i32
    return %arg0, %c0_i32, %c0_i32_0 : i32, i32, i32
  }
  func.func @transform_1(%arg0: i32) -> (i32, i32, i32) {
    %c0_i32 = arith.constant 0 : i32
    %c0_i32_0 = arith.constant 0 : i32
    %c0_i32_1 = arith.constant 0 : i32
    return %arg0, %c0_i32, %c0_i32_0 : i32, i32, i32
  }
  func.func @transform_2(%arg0: i32) -> (i32, i32) {
    %c0_i32 = arith.constant 0 : i32
    %c0_i32_0 = arith.constant 0 : i32
    %c0_i32_1 = arith.constant 0 : i32
    return %c0_i32, %c0_i32_0 : i32, i32
  }
  func.func @transform_3(%arg0: i32) -> (i32, i32) {
    %c0_i32 = arith.constant 0 : i32
    %c0_i32_0 = arith.constant 0 : i32
    %c0_i32_1 = arith.constant 0 : i32
    return %c0_i32, %c0_i32_0 : i32, i32
  }
  func.func @transform_4(%arg0: i32) -> (i32, i32) {
    %c0_i32 = arith.constant 0 : i32
    %c0_i32_0 = arith.constant 0 : i32
    %c0_i32_1 = arith.constant 0 : i32
    return %c0_i32, %c0_i32_0 : i32, i32
  }
  func.func @transform_5(%arg0: i32) -> (i32, i32) {
    %c0_i32 = arith.constant 0 : i32
    %c0_i32_0 = arith.constant 0 : i32
    %c0_i32_1 = arith.constant 0 : i32
    return %c0_i32, %c0_i32_0 : i32, i32
  }
  func.func @transform_6(%arg0: i32) -> (i32, i32) {
    %c0_i32 = arith.constant 0 : i32
    %c0_i32_0 = arith.constant 0 : i32
    %c0_i32_1 = arith.constant 0 : i32
    return %c0_i32, %c0_i32_0 : i32, i32
  }
  func.func @transform_7(%arg0: i32) -> (i32, i32) {
    %c0_i32 = arith.constant 0 : i32
    %c0_i32_0 = arith.constant 0 : i32
    %c0_i32_1 = arith.constant 0 : i32
    return %c0_i32, %c0_i32_0 : i32, i32
  }
  func.func @transform_8(%arg0: i32) -> (i32, i32, i32) {
    %c0_i32 = arith.constant 0 : i32
    %c0_i32_0 = arith.constant 0 : i32
    %c0_i32_1 = arith.constant 0 : i32
    return %arg0, %c0_i32, %c0_i32_0 : i32, i32, i32
  }
}

</mosaic_0001>

<bundles_post_ra>
// kernel: tpu_custom_call.1
= control target key start
LH: loop header
LB: loop body
LE: loop exit
PB: predicated region body
PF: predicated region fallthrough
CT: control target
= control target key end

     0   :  { %13 = vsyncpa [#allocation3], 0  ;;  %s2037_s0 = inlined_call_operand.vmem [shape: f32[8,16,32], index: 0, kind: input, shape index: {}]   ;;  %s2038_s1 = inlined_call_operand.hbm [shape: bf16[8,16,16], index: 1, kind: input, shape index: {}]   ;;  %s2039_s2 = inlined_call_operand.hbm [shape: f32[16,128], index: 2, kind: input, shape index: {}]   ;;  %s2040_s3 = inlined_call_operand.vmem [shape: bf16[64,32], index: 3, kind: input, shape index: {}]   ;;  %s2041_s4 = inlined_call_operand.vmem [shape: bf16[64,32], index: 4, kind: input, shape index: {}]   ;;  %s2042_s5 = inlined_call_operand.vmem [shape: bf16[64,32], index: 5, kind: input, shape index: {}]   ;;  %s2043_s6 = inlined_call_operand.vmem [shape: bf16[32,16], index: 6, kind: input, shape index: {}]   ;;  %s2044_s7 = inlined_call_operand.vmem [shape: bf16[16,8], index: 7, kind: input, shape index: {}]   ;;  %s2045_s8 = inlined_call_operand.hbm [shape: f32[8,16,128], index: 8, kind: output, shape index: {}]  }
   0x1   :  { %15 = vsyncpa [#allocation3 + $0x1], 0 }
   0x2   :  { %16 = vsyncpa [#allocation6], 0 }
   0x3   :  { %17 = vsyncpa [#allocation4], 0 }
   0x4   :  { %19 = vsyncpa [#allocation4 + $0x1], 0  ;;  %s1702_s27 = smov 0   ;;  %s1704_s28 = smov 0  }
   0x5   :  { %s1706_s29 = smov 0   ;;  %s1708_s30 = smov 0  }
   0x6 LB: > { %s1723_s9 = sadd.s32 4294967295, %s1643_s30   ;;  %s1251_s10 = sadd.s32 4294967294, %s1643_s30   ;;  %s1643_s30 = sphi %s1708_s30, %s2064_s30   ;;  %s1639_s29 = sphi %s1706_s29, %s2067_s29   ;;  %s1635_s28 = sphi %s1704_s28, %s2066_s28   ;;  %s1631_s27 = sphi %s1702_s27, %s2065_s27  }
   0x7   : > { %p71_p0 = scmp.ne.s32.totalorder %s1635_s28, %s1631_s27  ;;  %p2046_p1 = scmp.eq.s32.totalorder %s1723_s9, 0 }
   0x8   : > { %p227_p3 = scmp.eq.s32.totalorder %s1251_s10, 7  ;;  %p1252_p5 = scmp.ge.s32.totalorder %s1643_s30, 1 }
   0x9   : > { %p1732_p4 = por %p2046_p1, %p71_p0  ;;  %p234_p7 = scmp.lt.s32.totalorder %s1643_s30, 9 }
   0xa   : > { %p1737_p6 = por %p227_p3, %p71_p0  ;;  %s1645_s14 = smov [#allocation5]  }
   0xb   : > { %s2051_s11 = scalar_select %p1732_p4, 1, 0 }
   0xc   : > { %s2052_s12 = scalar_select %p1737_p6, 1, 0 }
   0xd   : > { %p1742_p8 = pnand %p1252_p5, %p234_p7  ;;  %s246_s15 = sshll.u32 %s1645_s14, 4  ;;  %s247_s15 = int_to_ptr.vmem [resolvable:$true] %s246_s15 }
   0xe   : > { %s1755_s17 = sadd.s32 1, %s1643_s30   ;;  %s58_s18 = sadd.s32 1, %s1639_s29 }
   0xf   : > { %s2053_s13 = scalar_select %p1742_p8, 1, 0 }
  0x10   : > { %p1413_p9 = pneg %p1742_p8  ;;  %2055 = sst [smem:[#allocation11_spill]] %s1755_s17 }
  0x11   : > { %s55_s19 = ssub.s32 %s1643_s30, %s1755_s17  ;;  %s1515_s22 = scalar_lea.hbm %s2039_s2, 256 }
  0x12   : > { %p1750_p10 = pnand %p1413_p9, %p2046_p1  ;;  %p1516_p11 = scmp.ne.s32.totalorder %s2039_s2, %s1515_s22 }
  0x13   : > { %p1522_p3 = scmp.lt.u32.totalorder %s1515_s22, %s2039_s2 }
  0x14   : > { %p1517_p12 = pneg %p1750_p10 }
  0x16   : > { %p1518_p13 = pnand %p1517_p12, %p1516_p11 }
  0x18   : > { %p1519_p0 = pneg %p1518_p13 }
  0x1a   : > { %p1524_p5 = pnand %p1522_p3, %p1519_p0 }
  0x1c   : > { %1527 = shalt.err (!%p1524_p5)
}
  0x1d   : > { %s1528_s10 = scalar_lea.vmem %s247_s15, 256  ;;  %p1536_p2 = scmp.lt.s32.totalorder %s247_s15, %s247_s15 }
  0x1e   : > { %p1529_p7 = scmp.ne.s32.totalorder %s247_s15, %s1528_s10  ;;  %p1537_p6 = scmp.lt.s32.totalorder %s1528_s10, %s1528_s10 }
  0x20   : > { %p1531_p9 = pnand %p1529_p7, %p1517_p12  ;;  %p1538_p4 = por %p1537_p6, %p1536_p2 }
  0x22   : > { %p1532_p1 = pneg %p1531_p9 }
  0x24   : > { %p1539_p8 = pnand %p1538_p4, %p1532_p1 }
  0x26   : > { %1542 = shalt.err (!%p1539_p8)
}
  0x27   : > { %s1646_s14 = smov 128   ;;  %s1647_s20 = smov 8  }
  0x28   : > { %1416 = dma.hbm_to_vmem [thread:$0]  (!%p1750_p10), %s2039_s2, 256, %s247_s15, [#allocation6], %s1646_s14, %s1646_s14, %s1647_s20  }
  0x29   : > { %p56_p11 = scmp.eq.s32.totalorder %s55_s19, 0  ;;  %p65_p2 = scmp.ne.s32.totalorder %s1639_s29, %s1635_s28 }
  0x2a   : > { %p66_p1 = scmp.eq.s32.totalorder %s1643_s30, 0  ;;  %p1426_p4 = scmp.lt.s32.totalorder %s1643_s30, 8 }
  0x2b   : > { %s1781_s23 = scalar_select %p56_p11, %s1639_s29, %s58_s18  }
  0x2c   : > { %p67_p6 = por %p66_p1, %p65_p2  ;;  %p2056_p8 = scmp.eq.s32.totalorder %s1723_s9, 7 }
  0x2d   : > { %s283_s25 = sand.u32 1, %s1639_s29   ;;  %s1308_s26 = sshll.u32 %s1643_s30, 7 }
  0x2e   : > { %p1785_p12 = por %p2056_p8, %p65_p2  ;;  %s1255_s10 = sshll.u32 %s283_s25, 3 }
  0x2f   : > { %s1794_s21 = scalar_lea.hbm %s2038_s1, %s1308_s26  ;;  %s287_s15 = scalar_lea.vmem [#allocation2], %s1255_s10 }
  0x30   : > { %s294_s18 = sshll.u32 %s287_s15, 4  ;;  %p1796_p10 = pnand %p1426_p4, %p67_p6  ;;  %s1800_s18 = int_to_ptr.vmem [resolvable:$true] %s294_s18 }
  0x31   : > { %s1802_s14 = scalar_lea.sflag [#allocation3], %s283_s25  ;;  %s1543_s20 = scalar_lea.hbm %s1794_s21, 128 }
  0x32   : > { %p1544_p13 = scmp.ne.s32.totalorder %s1794_s21, %s1543_s20  ;;  %p1545_p0 = pneg %p1796_p10 }
  0x33   : > { %s1548_s26 = scalar_lea.hbm %s2038_s1, 1024  ;;  %p1549_p7 = scmp.lt.u32.totalorder %s1794_s21, %s2038_s1 }
  0x34   : > { %p1546_p3 = pnand %p1545_p0, %p1544_p13  ;;  %p1550_p9 = scmp.lt.u32.totalorder %s1548_s26, %s1543_s20 }
  0x35   : > { %p1552_p2 = scmp.lt.u32.totalorder %s1543_s20, %s1794_s21 }
  0x36   : > { %p1547_p5 = pneg %p1546_p3  ;;  %p1551_p11 = por %p1550_p9, %p1549_p7 }
  0x38   : > { %p1553_p1 = por %p1552_p2, %p1551_p11 }
  0x3a   : > { %p1554_p4 = pnand %p1553_p1, %p1547_p5 }
  0x3c   : > { %1557 = shalt.err (!%p1554_p4)
}
  0x3d   : > { %s1558_s25 = scalar_lea.vmem %s1800_s18, 128  ;;  %s1648_s15 = smov [#allocation2]  }
  0x3e   : > { %p1559_p6 = scmp.ne.s32.totalorder %s1800_s18, %s1558_s25  ;;  %s1563_s17 = sshll.u32 %s1648_s15, 4  ;;  %s1564_s17 = int_to_ptr.vmem [resolvable:$false] %s1563_s17 }
  0x3f   : > { %s1565_s22 = scalar_lea.vmem %s1564_s17, 256  ;;  %p1566_p3 = scmp.lt.s32.totalorder %s1800_s18, %s1564_s17 }
  0x40   : > { %p1561_p8 = pnand %p1559_p6, %p1545_p0  ;;  %p1567_p7 = scmp.lt.s32.totalorder %s1565_s22, %s1558_s25 }
  0x42   : > { %p1562_p13 = pneg %p1561_p8  ;;  %p1568_p9 = por %p1567_p7, %p1566_p3 }
  0x44   : > { %p1569_p11 = pnand %p1568_p9, %p1562_p13 }
  0x46   : > { %1572 = shalt.err (!%p1569_p11)
}
  0x47   : > { %s1649_s20 = smov 64   ;;  %s1650_s26 = smov 4  }
  0x48   : > { %1420 = dma.hbm_to_vmem [thread:$0]  (!%p1796_p10), %s1794_s21, 128, %s1800_s18, %s1802_s14, %s1649_s20, %s1649_s20, %s1650_s26  }
  0x49   : > { %p2059_p0 = scmp.ne.s32.totalorder %s2053_s13, 0 }
  0x4a   : > { %s1833_s10 = sand.u32 (!%p2059_p0), 1, %s1635_s28   ;;  %p2060_p5 = scmp.ne.s32.totalorder (!%p2059_p0), %s2051_s11, 0 }
  0x4b   : > { %306 = sbr.rel (%p2059_p0) target bundleno = 3884 (0xf2c), region = 52  ;;  %s1259_s16 = sshll.u32 (!%p2059_p0), %s1833_s10, 3 }
  0x4c   : > { %s309_s25 = scalar_lea.sflag (!%p2059_p0), [#allocation3], %s1833_s10  ;;  %s1837_s15 = scalar_lea.vmem (!%p2059_p0), [#allocation2], %s1259_s16 }
  0x52   : > { %1618 = dma.done.wait (%p2060_p5), %s309_s25, 128  }
  0x53   : > { %1620 = vsyncadd (%p2060_p5), %s309_s25, 4294967168  ;;  %p2061_p10 = scmp.eq.s32.totalorder %s1723_s9, 0 }
  0x55   : > { %1622 = dma.done.wait (%p2061_p10), [#allocation6], 256   ;;  %p2062_p2 = pmov %p2061_p10 }
  0x56   : > { %p354_p1 = scmp.lt.s32.totalorder %s1723_s9, 7  ;;  %vm366_vm0 = vcmask 261120   ;;  %v1651_v14 = vmov 0.0   ;;  %vm1652_vm1 = vmmov 0   ;;  %v1264_v22 = vld [vmem:[#allocation5] ss:$0 sm:$0xff] }
  0x57   : > { %1624 = vsyncadd (%p2062_p2), [#allocation6], 4294967040  ;;  %1337 = vmatprep.subr.bf16.mxu0 %v1651_v14  ;;  %1343 = vmatprep.subr.bf16.mxu1 %v1651_v14  ;;  %v1472_v24 = vld [vmem:[%s2040_s3] sm:$0xff]   ;;  %v1473_v26 = vld [vmem:[%s2040_s3 + $0x8] sm:$0xff]   ;;  %s1653_s25 = smov 32   ;;  %vm414_vm2 = vcmask 130048  }
  0x58   : > { %s355_s13 = scalar_select %p354_p1, %s1723_s9, 7  ;;  %1339 = vmatprep.mubr.msk.bf16.mxu0 %vm1652_vm1, %v1651_v14  ;;  %1351 = vmatprep.mubr.msk.bf16.mxu1 %vm1652_vm1, %v1651_v14  ;;  %v1265_v28 = vld [vmem:[#allocation5 + $0x1] ss:$0 sm:$0xff]  ;;  %v1875_v37 = vld [vmem:[%s1837_s15] sm:$0xff]   ;;  %v1475_v38 = vld [vmem:[%s2040_s3 + $0x18] sm:$0xff]   ;;  %vm503_vm3 = vcmask 523264  }
  0x59   : > { %1344 = vmatpush3.bf16.msra.mxu1 %v1472_v24  ;;  %v1474_v32 = vld [vmem:[%s2040_s3 + $0x10] sm:$0xff]   ;;  %v1477_v24 = vld [vmem:[%s2041_s4 + $0x8] sm:$0xff]   ;;  %vm1102_vm4 = vcmask 64512   ;;  %vm1137_vm5 = vcmask 326656   ;;  %s1310_s18 = sshll.u32 %s1723_s9, 8  ;;  %s1143_s11 = scalar_lea.sflag [#allocation4], %s1833_s10 }
  0x5a   : > { %s1309_s21 = sshll.u32 %s355_s13, 4  ;;  %1345 = vmatprep.subr.bf16.mxu1 %v1651_v14  ;;  %v1268_v46 = vld [vmem:[#allocation5 + $0x2] ss:$0 sm:$0xff]  ;;  %s1261_s13 = sshll.u32 %s1833_s10, 4 }
  0x5b   : > { %s358_s14 = scalar_lea.vmem %s2037_s0, %s1309_s21  ;;  %s353_s21 = scalar_lea.vmem [#allocation7], %s1261_s13 }
  0x5c   : > { %v360_v0 = vld [vmem:[%s358_s14] sm:$0xff]  ;;  %v361_v1 = vld [vmem:[%s358_s14 + $0x8] sm:$0xff]  ;;  %s1156_s15 = sshll.u32 %s353_s21, 4  ;;  %s1992_s14 = scalar_lea.hbm %s2045_s8, %s1310_s18  ;;  %s1987_s15 = int_to_ptr.vmem [resolvable:$true] %s1156_s15 }
  0x5d   : > { %v367_v2 = vsel %vm366_vm0, %v360_v0, 0.0  ;;  %v370_v3 = vsel %vm366_vm0, %v361_v1, 0.0  ;;  %1346 = vmatpush3.bf16.msra.mxu1 %v1473_v26  ;;  %v1479_v26 = vld [vmem:[%s2041_s4 + $0x18] sm:$0xff]   ;;  %s1573_s9 = scalar_lea.vmem %s1987_s15, 256  ;;  %s1654_s17 = smov [#allocation7]  }
  0x5e   : > { %368 = vadd.xlane.f32.xlu0 %v367_v2  ;;  %1347 = vmatprep.subr.bf16.mxu1 %v1651_v14  ;;  %p1574_p4 = scmp.ne.s32.totalorder %s1987_s15, %s1573_s9  ;;  %s1577_s22 = sshll.u32 %s1654_s17, 4  ;;  %s1578_s22 = int_to_ptr.vmem [resolvable:$false] %s1577_s22 }
  0x5f   : > { %s1579_s20 = scalar_lea.vmem %s1578_s22, 512  ;;  %p1580_p13 = scmp.lt.s32.totalorder %s1987_s15, %s1578_s22 }
  0x60   : > { %p1575_p6 = pnand %p1574_p4, %p1785_p12  ;;  %p1581_p3 = scmp.lt.s32.totalorder %s1579_s20, %s1573_s9 }
  0x61   : > { %1348 = vmatpush3.bf16.msra.mxu1 %v1474_v32 }
  0x62   : > { %371 = vadd.xlane.f32.xlu0 %v370_v3  ;;  %1349 = vmatprep.subr.bf16.mxu1 %v1651_v14  ;;  %p1576_p8 = pneg %p1575_p6  ;;  %p1582_p7 = por %p1581_p3, %p1580_p13 }
  0x64   : > { %p1583_p9 = pnand %p1582_p7, %p1576_p8 }
  0x65   : > { %1350 = vmatpush3.bf16.msra.mxu1 %v1475_v38 }
  0x66   : > { %1373 = vmatprep.subr.bf16.mxu1 %v1651_v14 }
  0xeb   : > { %v369_v4 = vpop.xlane.xlu0 %368 }
  0xec   : > { %v374_v5 = vmul.f32 0.03125, %v369_v4 }
  0xee   : > { %v376_v6 = vsub.f32 %v360_v0, %v374_v5 }
  0xef   : > { %v372_v7 = vpop.xlane.xlu0 %371 }
  0xf0   : > { %v375_v8 = vmul.f32 0.03125, %v372_v7  ;;  %v378_v9 = vmul.f32 %v376_v6, %v376_v6 }
  0xf2   : > { %v377_v10 = vsub.f32 %v361_v1, %v375_v8  ;;  %v380_v11 = vsel %vm366_vm0, %v378_v9, 0.0 }
  0xf3   : > { %381 = vadd.xlane.f32.xlu1 %v380_v11 }
  0xf4   : > { %v379_v12 = vmul.f32 %v377_v10, %v377_v10 }
  0xf6   : > { %v383_v13 = vsel %vm366_vm0, %v379_v12, 0.0 }
  0xf7   : > { %384 = vadd.xlane.f32.xlu1 %v383_v13  ;;  %v1274_v13 = vld [vmem:[#allocation5 + $0x3] ss:$0 sm:$0xff] }
 0x180   : > { %v382_v15 = vpop.xlane.xlu1 %381 }
 0x181   : > { %v386_v16 = vmul.f32 0.03125, %v382_v15 }
 0x183   : > { %v388_v17 = vadd.f32 1e-05, %v386_v16 }
 0x184   : > { %v385_v18 = vpop.xlane.xlu1 %384 }
 0x185   : > { %1487 = vrsqrt.f32 %v388_v17  ;;  %v387_v19 = vmul.f32 0.03125, %v385_v18  ;;  %v1275_v18 = vld [vmem:[#allocation5 + $0x4] ss:$0 sm:$0xff] }
 0x187   : > { %v389_v20 = vadd.f32 1e-05, %v387_v19 }
 0x189   : > { %1489 = vrsqrt.f32 %v389_v20 }
 0x18f   : > { %v1488_v21 = vpop.eup %1487 }
 0x190   : > { %v392_v23 = vmul.f32 %v1488_v21, %v376_v6 }
 0x192   : > { %v398_v25 = vmul.f32 %v1264_v22, %v392_v23  ;;  %v1476_v23 = vld [vmem:[%s2041_s4] sm:$0xff]  }
 0x193   : > { %v1490_v27 = vpop.eup %1489 }
 0x194   : > { %v393_v29 = vmul.f32 %v1490_v27, %v377_v10  ;;  %v404_v31 = vadd.f32 %v1265_v28, %v398_v25  ;;  %v1478_v25 = vld [vmem:[%s2041_s4 + $0x10] sm:$0xff]  }
 0x196   : > { %v399_v30 = vmul.f32 %v1264_v22, %v393_v29  ;;  %v406_v34 = vmax.f32 %v404_v31, 0.0 }
 0x198   : > { %v405_v33 = vadd.f32 %v1265_v28, %v399_v30 }
 0x19a   : > { %v407_v35 = vmax.f32 %v405_v33, 0.0 }
 0x19c   : > { %v408_v36 = vpack.c.bf16 %v407_v35, %v406_v34 }
 0x19e   : > { %461 = vrot.lane.b32.xlu0 %v408_v36, %s1653_s25  ;;  %1338 = vmatpush3.bf16.msra.mxu0 %v408_v36 }
 0x19f   : > { %1355 = vmatprep.subr.bf16.mxu0 %v1651_v14 }
 0x1a1   : > { %1340 = vmatmul.mubr.msk.bf16.vlgmr.msra.gmra.mrb[0].mxu0 %vm414_vm2, %v1875_v37 }
 0x1a2   : > { %1357 = vmatprep.mubr.msk.bf16.mxu0 %vm1652_vm1, %v1651_v14 }
 0x210   : > { %v462_v44 = vpop.permute.xlu0 %461 }
 0x274   : > { %v452_v39 = vpop.f32.mrb[0].mxu0 }
 0x275   : > { %v1341_v40 = vpop.f32.mrb[1].mxu0 }
 0x276   : > { %v455_v41 = vpop.f32.mrb[2].mxu0 }
 0x277   : > { %v459_v42 = vpack.c.bf16 %v455_v41, %v452_v39  ;;  %v1342_v43 = vpop.f32.mrb[3].mxu0 }
 0x279   : > { %v465_v45 = vsel %vm366_vm0, %v459_v42, %v462_v44 }
 0x27a   : > { %1352 = vmatmul.mubr.msk.bf16.vlgmr.msra.gmra.mrb[0].mxu1 %vm503_vm3, %v465_v45 }
 0x27b   : > { %1375 = vmatprep.mubr.msk.bf16.mxu1 %vm1652_vm1, %v1651_v14 }
 0x34d   : > { %v540_v47 = vpop.f32.mrb[0].mxu1 }
 0x34e   : > { %v541_v48 = vadd.f32 %v1268_v46, %v540_v47  ;;  %v1353_v49 = vpop.f32.mrb[1].mxu1 }
 0x34f   : > { %v543_v50 = vpop.f32.mrb[2].mxu1 }
 0x350   : > { %v547_v51 = vmax.f32 %v541_v48, 0.0  ;;  %v544_v52 = vadd.f32 %v1268_v46, %v543_v50  ;;  %v1354_v53 = vpop.f32.mrb[3].mxu1 }
 0x352   : > { %v548_v54 = vmax.f32 %v544_v52, 0.0  ;;  %v549_v55 = vadd.f32 %v547_v51, %v406_v34  ;;  %v1277_v34 = vld [vmem:[#allocation5 + $0x5] ss:$0 sm:$0xff] }
 0x354   : > { %v553_v56 = vsel %vm366_vm0, %v549_v55, 0.0  ;;  %v550_v57 = vadd.f32 %v548_v54, %v407_v35 }
 0x355   : > { %554 = vadd.xlane.f32.xlu1 %v553_v56 }
 0x356   : > { %v556_v58 = vsel %vm366_vm0, %v550_v57, 0.0 }
 0x359   : > { %557 = vadd.xlane.f32.xlu1 %v556_v58 }
 0x3e2   : > { %v555_v59 = vpop.xlane.xlu1 %554 }
 0x3e3   : > { %v559_v60 = vmul.f32 0.03125, %v555_v59 }
 0x3e5   : > { %v561_v61 = vsub.f32 %v549_v55, %v559_v60 }
 0x3e6   : > { %v558_v62 = vpop.xlane.xlu1 %557 }
 0x3e7   : > { %v560_v63 = vmul.f32 0.03125, %v558_v62  ;;  %v563_v0 = vmul.f32 %v561_v61, %v561_v61 }
 0x3e9   : > { %v562_v1 = vsub.f32 %v550_v57, %v560_v63  ;;  %v565_v2 = vsel %vm366_vm0, %v563_v0, 0.0 }
 0x3ea   : > { %566 = vadd.xlane.f32.xlu1 %v565_v2  ;;  %v1283_v2 = vld [vmem:[#allocation5 + $0x6] ss:$0 sm:$0xff] }
 0x3eb   : > { %v564_v3 = vmul.f32 %v562_v1, %v562_v1 }
 0x3ed   : > { %v568_v4 = vsel %vm366_vm0, %v564_v3, 0.0 }
 0x3ee   : > { %569 = vadd.xlane.f32.xlu1 %v568_v4 }
 0x477   : > { %v567_v5 = vpop.xlane.xlu1 %566 }
 0x478   : > { %v571_v6 = vmul.f32 0.03125, %v567_v5 }
 0x47a   : > { %v573_v7 = vadd.f32 1e-05, %v571_v6  ;;  %v1284_v6 = vld [vmem:[#allocation5 + $0x7] ss:$0 sm:$0xff] }
 0x47b   : > { %v570_v8 = vpop.xlane.xlu1 %569 }
 0x47c   : > { %1491 = vrsqrt.f32 %v573_v7  ;;  %v572_v9 = vmul.f32 0.03125, %v570_v8 }
 0x47e   : > { %v574_v10 = vadd.f32 1e-05, %v572_v9 }
 0x480   : > { %1493 = vrsqrt.f32 %v574_v10 }
 0x486   : > { %v1492_v11 = vpop.eup %1491 }
 0x487   : > { %v577_v12 = vmul.f32 %v1492_v11, %v561_v61  ;;  %v1480_v11 = vld [vmem:[%s2042_s5] sm:$0xff]  }
 0x489   : > { %v583_v17 = vmul.f32 %v1274_v13, %v577_v12  ;;  %v1481_v12 = vld [vmem:[%s2042_s5 + $0x8] sm:$0xff]  }
 0x48a   : > { %v1494_v15 = vpop.eup %1493 }
 0x48b   : > { %v578_v16 = vmul.f32 %v1494_v15, %v562_v1  ;;  %v589_v20 = vadd.f32 %v1275_v18, %v583_v17 }
 0x48d   : > { %v584_v19 = vmul.f32 %v1274_v13, %v578_v16  ;;  %v1482_v13 = vld [vmem:[%s2042_s5 + $0x10] sm:$0xff]  }
 0x48f   : > { %v590_v21 = vadd.f32 %v1275_v18, %v584_v19 }
 0x491   : > { %v591_v22 = vpack.c.bf16 %v590_v21, %v589_v20 }
 0x493   : > { %635 = vrot.lane.b32.xlu1 %v591_v22, %s1653_s25  ;;  %1356 = vmatpush3.bf16.msra.mxu0 %v591_v22  ;;  %v1286_v22 = vld [vmem:[#allocation5 + $0x8] ss:$0 sm:$0xff] }
 0x494   : > { %1361 = vmatprep.subr.bf16.mxu0 %v1651_v14 }
 0x496   : > { %1358 = vmatmul.mubr.msk.bf16.vlgmr.msra.gmra.mrb[4].mxu0 %vm414_vm2, %v1875_v37 }
 0x497   : > { %1362 = vmatpush3.bf16.msra.mxu0 %v1476_v23  ;;  %1369 = vmatprep.mubr.msk.bf16.mxu0 %vm1652_vm1, %v1651_v14 }
 0x498   : > { %1363 = vmatprep.subr.bf16.mxu0 %v1651_v14 }
 0x49b   : > { %1364 = vmatpush3.bf16.msra.mxu0 %v1477_v24 }
 0x49c   : > { %1365 = vmatprep.subr.bf16.mxu0 %v1651_v14 }
 0x49f   : > { %1366 = vmatpush3.bf16.msra.mxu0 %v1478_v25 }
 0x4a0   : > { %1367 = vmatprep.subr.bf16.mxu0 %v1651_v14 }
 0x4a3   : > { %1368 = vmatpush3.bf16.msra.mxu0 %v1479_v26 }
 0x4a4   : > { %1391 = vmatprep.subr.bf16.mxu0 %v1651_v14 }
 0x505   : > { %v636_v32 = vpop.permute.xlu1 %635 }
 0x569   : > { %v626_v27 = vpop.f32.mrb[4].mxu0 }
 0x56a   : > { %v1359_v28 = vpop.f32.mrb[5].mxu0 }
 0x56b   : > { %v629_v29 = vpop.f32.mrb[6].mxu0 }
 0x56c   : > { %v633_v30 = vpack.c.bf16 %v629_v29, %v626_v27  ;;  %v1360_v31 = vpop.f32.mrb[7].mxu0 }
 0x56e   : > { %v639_v33 = vsel %vm366_vm0, %v633_v30, %v636_v32 }
 0x56f   : > { %1370 = vmatmul.mubr.msk.bf16.vlgmr.msra.gmra.mrb[8].mxu0 %vm503_vm3, %v639_v33 }
 0x570   : > { %1395 = vmatprep.mubr.msk.bf16.mxu0 %vm1652_vm1, %v1651_v14 }
 0x642   : > { %v713_v35 = vpop.f32.mrb[8].mxu0 }
 0x643   : > { %v714_v36 = vadd.f32 %v1277_v34, %v713_v35  ;;  %v1371_v38 = vpop.f32.mrb[9].mxu0 }
 0x644   : > { %v716_v39 = vpop.f32.mrb[10].mxu0 }
 0x645   : > { %v720_v40 = vmax.f32 %v714_v36, 0.0  ;;  %v717_v41 = vadd.f32 %v1277_v34, %v716_v39  ;;  %v1372_v42 = vpop.f32.mrb[11].mxu0 }
 0x647   : > { %v721_v43 = vmax.f32 %v717_v41, 0.0  ;;  %v722_v44 = vadd.f32 %v720_v40, %v589_v20 }
 0x649   : > { %v726_v45 = vsel %vm366_vm0, %v722_v44, 0.0  ;;  %v723_v46 = vadd.f32 %v721_v43, %v590_v21 }
 0x64a   : > { %727 = vadd.xlane.f32.xlu0 %v726_v45  ;;  %v1485_v45 = vld [vmem:[%s2043_s6 + $0x8] sm:$0xff]  }
 0x64b   : > { %v729_v47 = vsel %vm366_vm0, %v723_v46, 0.0 }
 0x64c   : > { %730 = vadd.xlane.f32.xlu1 %v729_v47 }
 0x6d7   : > { %v728_v48 = vpop.xlane.xlu0 %727 }
 0x6d8   : > { %v732_v49 = vmul.f32 0.03125, %v728_v48 }
 0x6d9   : > { %v731_v50 = vpop.xlane.xlu1 %730 }
 0x6da   : > { %v734_v51 = vsub.f32 %v722_v44, %v732_v49  ;;  %v733_v52 = vmul.f32 0.03125, %v731_v50  ;;  %v1484_v44 = vld [vmem:[%s2043_s6] sm:$0xff]  }
 0x6db   : > { %1392 = vmatpush3.bf16.msra.mxu0 %v1484_v44 }
 0x6dc   : > { %v735_v53 = vsub.f32 %v723_v46, %v733_v52  ;;  %v736_v54 = vmul.f32 %v734_v51, %v734_v51  ;;  %1393 = vmatprep.subr.bf16.mxu0 %v1651_v14 }
 0x6de   : > { %v738_v55 = vsel %vm366_vm0, %v736_v54, 0.0  ;;  %v737_v56 = vmul.f32 %v735_v53, %v735_v53  ;;  %v1292_v54 = vld [vmem:[#allocation5 + $0x9] ss:$0 sm:$0xff] }
 0x6df   : > { %739 = vadd.xlane.f32.xlu0 %v738_v55  ;;  %1394 = vmatpush3.bf16.msra.mxu0 %v1485_v45 }
 0x6e0   : > { %v741_v57 = vsel %vm366_vm0, %v737_v56, 0.0  ;;  %1399 = vmatprep.subr.bf16.mxu0 %v1651_v14 }
 0x6e3   : > { %742 = vadd.xlane.f32.xlu0 %v741_v57 }
 0x76c   : > { %v740_v58 = vpop.xlane.xlu0 %739 }
 0x76d   : > { %v744_v59 = vmul.f32 0.03125, %v740_v58  ;;  %v1293_v58 = vld [vmem:[#allocation5 + $0xa] ss:$0 sm:$0xff] }
 0x76f   : > { %v746_v60 = vadd.f32 1e-05, %v744_v59 }
 0x770   : > { %v743_v61 = vpop.xlane.xlu0 %742 }
 0x771   : > { %1495 = vrsqrt.f32 %v746_v60  ;;  %v745_v62 = vmul.f32 0.03125, %v743_v61 }
 0x773   : > { %v747_v63 = vadd.f32 1e-05, %v745_v62 }
 0x775   : > { %1497 = vrsqrt.f32 %v747_v63  ;;  %v1294_v63 = vld [vmem:[#allocation5 + $0xb] ss:$0 sm:$0xff] }
 0x77b   : > { %v1496_v0 = vpop.eup %1495 }
 0x77c   : > { %v750_v1 = vmul.f32 %v1496_v0, %v734_v51 }
 0x77e   : > { %v756_v5 = vmul.f32 %v1283_v2, %v750_v1 }
 0x77f   : > { %v1498_v3 = vpop.eup %1497 }
 0x780   : > { %v751_v4 = vmul.f32 %v1498_v3, %v735_v53  ;;  %v762_v8 = vadd.f32 %v1284_v6, %v756_v5 }
 0x782   : > { %v757_v7 = vmul.f32 %v1283_v2, %v751_v4 }
 0x784   : > { %v763_v9 = vadd.f32 %v1284_v6, %v757_v7 }
 0x786   : > { %v764_v10 = vpack.c.bf16 %v763_v9, %v762_v8 }
 0x788   : > { %808 = vrot.lane.b32.xlu0 %v764_v10, %s1653_s25  ;;  %1374 = vmatpush3.bf16.msra.mxu1 %v764_v10 }
 0x789   : > { %1379 = vmatprep.subr.bf16.mxu1 %v1651_v14 }
 0x78b   : > { %1376 = vmatmul.mubr.msk.bf16.vlgmr.msra.gmra.mrb[4].mxu1 %vm414_vm2, %v1875_v37  ;;  %v1483_v37 = vld [vmem:[%s2042_s5 + $0x18] sm:$0xff]  }
 0x78c   : > { %1380 = vmatpush3.bf16.msra.mxu1 %v1480_v11  ;;  %1387 = vmatprep.mubr.msk.bf16.mxu1 %vm1652_vm1, %v1651_v14 }
 0x78d   : > { %1381 = vmatprep.subr.bf16.mxu1 %v1651_v14 }
 0x790   : > { %1382 = vmatpush3.bf16.msra.mxu1 %v1481_v12 }
 0x791   : > { %1383 = vmatprep.subr.bf16.mxu1 %v1651_v14 }
 0x794   : > { %1384 = vmatpush3.bf16.msra.mxu1 %v1482_v13 }
 0x795   : > { %1385 = vmatprep.subr.bf16.mxu1 %v1651_v14 }
 0x798   : > { %1386 = vmatpush3.bf16.msra.mxu1 %v1483_v37 }
 0x7fa   : > { %v809_v20 = vpop.permute.xlu0 %808 }
 0x85e   : > { %v799_v15 = vpop.f32.mrb[4].mxu1 }
 0x85f   : > { %v1377_v16 = vpop.f32.mrb[5].mxu1 }
 0x860   : > { %v802_v17 = vpop.f32.mrb[6].mxu1 }
 0x861   : > { %v806_v18 = vpack.c.bf16 %v802_v17, %v799_v15  ;;  %v1378_v19 = vpop.f32.mrb[7].mxu1 }
 0x862   : > { %v1486_v19 = vld [vmem:[%s2044_s7] sm:$0xff]  }
 0x863   : > { %v812_v21 = vsel %vm366_vm0, %v806_v18, %v809_v20 }
 0x864   : > { %1388 = vmatmul.mubr.msk.bf16.vlgmr.msra.gmra.mrb[8].mxu1 %vm503_vm3, %v812_v21 }
 0x937   : > { %v886_v23 = vpop.f32.mrb[8].mxu1 }
 0x938   : > { %v887_v24 = vadd.f32 %v1286_v22, %v886_v23  ;;  %v1389_v25 = vpop.f32.mrb[9].mxu1 }
 0x939   : > { %v889_v26 = vpop.f32.mrb[10].mxu1 }
 0x93a   : > { %v893_v27 = vmax.f32 %v887_v24, 0.0  ;;  %v890_v28 = vadd.f32 %v1286_v22, %v889_v26  ;;  %v1390_v29 = vpop.f32.mrb[11].mxu1 }
 0x93c   : > { %v894_v30 = vmax.f32 %v890_v28, 0.0  ;;  %v897_v31 = vsel %vm366_vm0, %v893_v27, 0.0  ;;  %v1298_v28 = vld [vmem:[#allocation5 + $0xc] ss:$0 sm:$0xff] }
 0x93d   : > { %898 = vadd.xlane.f32.xlu1 %v897_v31 }
 0x93e   : > { %v900_v32 = vsel %vm366_vm0, %v894_v30, 0.0 }
 0x941   : > { %901 = vadd.xlane.f32.xlu1 %v900_v32  ;;  %v1299_v32 = vld [vmem:[#allocation5 + $0xd] ss:$0 sm:$0xff] }
 0x9ca   : > { %v899_v33 = vpop.xlane.xlu1 %898 }
 0x9cb   : > { %v903_v34 = vmul.f32 0.03125, %v899_v33 }
 0x9cd   : > { %v905_v35 = vsub.f32 %v893_v27, %v903_v34 }
 0x9ce   : > { %v902_v36 = vpop.xlane.xlu1 %901 }
 0x9cf   : > { %v904_v38 = vmul.f32 0.03125, %v902_v36  ;;  %v907_v39 = vmul.f32 %v905_v35, %v905_v35 }
 0x9d1   : > { %v906_v40 = vsub.f32 %v894_v30, %v904_v38  ;;  %v909_v41 = vsel %vm366_vm0, %v907_v39, 0.0  ;;  %v1300_v38 = vld [vmem:[#allocation5 + $0xe] ss:$0 sm:$0xff] }
 0x9d2   : > { %910 = vadd.xlane.f32.xlu1 %v909_v41 }
 0x9d3   : > { %v908_v42 = vmul.f32 %v906_v40, %v906_v40 }
 0x9d5   : > { %v912_v43 = vsel %vm366_vm0, %v908_v42, 0.0 }
 0x9d6   : > { %913 = vadd.xlane.f32.xlu1 %v912_v43 }
 0xa5f   : > { %v911_v46 = vpop.xlane.xlu1 %910 }
 0xa60   : > { %v915_v47 = vmul.f32 0.03125, %v911_v46 }
 0xa62   : > { %v917_v48 = vadd.f32 1e-05, %v915_v47 }
 0xa63   : > { %v914_v49 = vpop.xlane.xlu1 %913 }
 0xa64   : > { %1499 = vrsqrt.f32 %v917_v48  ;;  %v916_v50 = vmul.f32 0.03125, %v914_v49 }
 0xa66   : > { %v918_v51 = vadd.f32 1e-05, %v916_v50 }
 0xa68   : > { %1501 = vrsqrt.f32 %v918_v51 }
 0xa6e   : > { %v1500_v52 = vpop.eup %1499 }
 0xa6f   : > { %v921_v53 = vmul.f32 %v1500_v52, %v905_v35 }
 0xa71   : > { %v927_v56 = vmul.f32 %v1292_v54, %v921_v53 }
 0xa72   : > { %v1502_v55 = vpop.eup %1501 }
 0xa73   : > { %v922_v57 = vmul.f32 %v1502_v55, %v906_v40  ;;  %v1960_v60 = vadd.f32 %v1293_v58, %v927_v56 }
 0xa75   : > { %v928_v59 = vmul.f32 %v1292_v54, %v922_v57 }
 0xa77   : > { %v1962_v61 = vadd.f32 %v1293_v58, %v928_v59 }
 0xa79   : > { %v935_v62 = vpack.c.bf16 %v1962_v61, %v1960_v60 }
 0xa7b   : > { %1396 = vmatmul.mubr.msk.bf16.vlgmr.msra.gmra.mrb[12].mxu0 %vm366_vm0, %v935_v62 }
 0xa7c   : > { %1401 = vmatprep.mubr.msk.bf16.mxu0 %vm1652_vm1, %v1651_v14  ;;  %1400 = vmatpush3.bf16.msra.mxu0 %v1486_v19 }
 0xb4e   : > { %v994_v0 = vpop.f32.mrb[12].mxu0 }
 0xb4f   : > { %v995_v1 = vadd.f32 %v1294_v63, %v994_v0  ;;  %v1397_v2 = vpop.f32.mrb[13].mxu0 }
 0xb50   : > { %v997_v3 = vpop.f32.mrb[14].mxu0 }
 0xb51   : > { %v1001_v4 = vmax.f32 %v995_v1, 0.0  ;;  %v998_v5 = vadd.f32 %v1294_v63, %v997_v3  ;;  %v1398_v6 = vpop.f32.mrb[15].mxu0 }
 0xb53   : > { %v1002_v7 = vmax.f32 %v998_v5, 0.0  ;;  %v1005_v8 = vsel %vm414_vm2, %v1001_v4, 0.0 }
 0xb54   : > { %1006 = vadd.xlane.f32.xlu0 %v1005_v8 }
 0xb55   : > { %v1008_v9 = vsel %vm414_vm2, %v1002_v7, 0.0 }
 0xb56   : > { %1009 = vadd.xlane.f32.xlu1 %v1008_v9 }
 0xbe1   : > { %v1007_v10 = vpop.xlane.xlu0 %1006 }
 0xbe2   : > { %v1012_v11 = vmul.f32 0.0625, %v1007_v10 }
 0xbe3   : > { %v1010_v12 = vpop.xlane.xlu1 %1009 }
 0xbe4   : > { %v1014_v13 = vsub.f32 %v1001_v4, %v1012_v11  ;;  %v1013_v14 = vmul.f32 0.0625, %v1010_v12 }
 0xbe6   : > { %v1015_v37 = vsub.f32 %v1002_v7, %v1013_v14  ;;  %v1016_v15 = vmul.f32 %v1014_v13, %v1014_v13 }
 0xbe8   : > { %v1018_v16 = vsel %vm414_vm2, %v1016_v15, 0.0  ;;  %v1017_v17 = vmul.f32 %v1015_v37, %v1015_v37 }
 0xbe9   : > { %1019 = vadd.xlane.f32.xlu1 %v1018_v16 }
 0xbea   : > { %v1021_v18 = vsel %vm414_vm2, %v1017_v17, 0.0 }
 0xbed   : > { %1022 = vadd.xlane.f32.xlu1 %v1021_v18 }
 0xc76   : > { %v1020_v20 = vpop.xlane.xlu1 %1019 }
 0xc77   : > { %v1024_v21 = vmul.f32 0.0625, %v1020_v20 }
 0xc79   : > { %v1026_v22 = vadd.f32 1e-05, %v1024_v21 }
 0xc7a   : > { %v1023_v23 = vpop.xlane.xlu1 %1022 }
 0xc7b   : > { %1503 = vrsqrt.f32 %v1026_v22  ;;  %v1025_v24 = vmul.f32 0.0625, %v1023_v23 }
 0xc7d   : > { %v1027_v25 = vadd.f32 1e-05, %v1025_v24 }
 0xc7f   : > { %1505 = vrsqrt.f32 %v1027_v25 }
 0xc85   : > { %v1504_v26 = vpop.eup %1503 }
 0xc86   : > { %v1030_v27 = vmul.f32 %v1504_v26, %v1014_v13 }
 0xc88   : > { %v1036_v30 = vmul.f32 %v1298_v28, %v1030_v27 }
 0xc89   : > { %v1506_v29 = vpop.eup %1505 }
 0xc8a   : > { %v1031_v31 = vmul.f32 %v1506_v29, %v1015_v37  ;;  %v1042_v34 = vadd.f32 %v1299_v32, %v1036_v30 }
 0xc8c   : > { %v1037_v33 = vmul.f32 %v1298_v28, %v1031_v31 }
 0xc8e   : > { %v1043_v35 = vadd.f32 %v1299_v32, %v1037_v33 }
 0xc90   : > { %v1044_v36 = vpack.c.bf16 %v1043_v35, %v1042_v34 }
 0xc92   : > { %1402 = vmatmul.mubr.msk.bf16.vlgmr.msra.gmra.mrb[16].mxu0 %vm414_vm2, %v1044_v36 }
 0xd65   : > { %v1095_v39 = vpop.f32.mrb[16].mxu0 }
 0xd66   : > { %v1096_v40 = vadd.f32 %v1300_v38, %v1095_v39  ;;  %v1403_v41 = vpop.f32.mrb[17].mxu0 }
 0xd67   : > { %v1098_v42 = vpop.f32.mrb[18].mxu0 }
 0xd68   : > { %v1099_v43 = vadd.f32 %v1300_v38, %v1098_v42  ;;  %v1404_v44 = vpop.f32.mrb[19].mxu0  ;;  %v1103_v45 = vsel %vm1102_vm4, %v1096_v40, -inf }
 0xd69   : > { %1104 = vmax.xlane.f32.xlu1 %v1103_v45 }
 0xd6a   : > { %v1106_v46 = vsel %vm1102_vm4, %v1099_v43, -inf }
 0xd6d   : > { %1107 = vmax.xlane.f32.xlu1 %v1106_v46 }
 0xdf6   : > { %v1105_v47 = vpop.xlane.xlu1 %1104 }
 0xdf7   : > { %v1109_v48 = vsub.f32 %v1096_v40, %v1105_v47 }
 0xdf9   : > { %v1111_v49 = vmul.f32 1.442695, %v1109_v48 }
 0xdfa   : > { %v1108_v50 = vpop.xlane.xlu1 %1107 }
 0xdfb   : > { %1507 = vpow2.f32 %v1111_v49  ;;  %v1110_v51 = vsub.f32 %v1099_v43, %v1108_v50 }
 0xdfd   : > { %v1113_v52 = vmul.f32 1.442695, %v1110_v51 }
 0xdff   : > { %1509 = vpow2.f32 %v1113_v52 }
 0xe05   : > { %v1508_v53 = vpop.eup %1507 }
 0xe06   : > { %v1115_v54 = vsel %vm1102_vm4, %v1508_v53, 0.0 }
 0xe07   : > { %1116 = vadd.xlane.f32.xlu1 %v1115_v54 }
 0xe09   : > { %v1510_v55 = vpop.eup %1509 }
 0xe0a   : > { %v1118_v56 = vsel %vm1102_vm4, %v1510_v55, 0.0 }
 0xe0b   : > { %1119 = vadd.xlane.f32.xlu1 %v1118_v56 }
 0xe94   : > { %v1117_v57 = vpop.xlane.xlu1 %1116 }
 0xe95   : > { %1511 = vlog2.f32 %v1117_v57 }
 0xe98   : > { %v1120_v58 = vpop.xlane.xlu1 %1119 }
 0xe99   : > { %1513 = vlog2.f32 %v1120_v58 }
 0xe9f   : > { %v1512_v59 = vpop.eup %1511 }
 0xea0   : > { %v1122_v62 = vmul.f32 0.6931472, %v1512_v59 }
 0xea2   : > { %v1125_v63 = vsub.f32 %v1109_v48, %v1122_v62 }
 0xea3   : > { %v1514_v0 = vpop.eup %1513 }
 0xea4   : > { %v1124_v1 = vmul.f32 0.6931472, %v1514_v0  ;;  %1129 = vrot.lane.b32.xlu1 %v1125_v63, %s1653_s25 }
 0xea6   : > { %v1126_v2 = vsub.f32 %v1110_v51, %v1124_v1 }
 0xea8   : > { %1131 = vrot.lane.b32.xlu0 %v1126_v2, %s1653_s25 }
 0xf16   : > { %v1130_v3 = vpop.permute.xlu1 %1129 }
 0xf17   : > { %v1135_v4 = vsel %vm366_vm0, %v1960_v60, %v1130_v3 }
 0xf18   : > { %v1138_v5 = vsel %vm1137_vm5, %v1135_v4, 0.0 }
 0xf19   : > { %1140 = vst [vmem:[%s353_s21] sm:$0xff] %v1138_v5 }
 0xf1a   : > { %v1132_v6 = vpop.permute.xlu0 %1131 }
 0xf1b   : > { %v1136_v7 = vsel %vm366_vm0, %v1962_v61, %v1132_v6 }
 0xf1c   : > { %v1139_v8 = vsel %vm1137_vm5, %v1136_v7, 0.0 }
 0xf1d   : > { %1141 = vst [vmem:[%s353_s21 + $0x8] sm:$0xff] %v1139_v8 }
 0xf1e   : > { %1586 = shalt.err (!%p1583_p9)
}
 0xf1f   : > { %s1587_s26 = scalar_lea.hbm %s1992_s14, 256  ;;  %s1591_s21 = scalar_lea.hbm %s2045_s8, 2048 }
 0xf20   : > { %p1588_p11 = scmp.ne.s32.totalorder %s1992_s14, %s1587_s26  ;;  %p1592_p10 = scmp.lt.u32.totalorder %s1992_s14, %s2045_s8 }
 0xf21   : > { %p1593_p2 = scmp.lt.u32.totalorder %s1591_s21, %s1587_s26  ;;  %p1595_p4 = scmp.lt.u32.totalorder %s1587_s26, %s1992_s14 }
 0xf22   : > { %p1589_p0 = pnand %p1588_p11, %p1785_p12 }
 0xf23   : > { %p1594_p1 = por %p1593_p2, %p1592_p10 }
 0xf24   : > { %p1590_p5 = pneg %p1589_p0 }
 0xf25   : > { %p1596_p6 = por %p1595_p4, %p1594_p1 }
 0xf27   : > { %p1597_p8 = pnand %p1596_p6, %p1590_p5 }
 0xf29   : > { %1600 = shalt.err (!%p1597_p8)
}
 0xf2a   : > { %s1655_s19 = smov 128   ;;  %s1656_s9 = smov 8  }
 0xf2b   : > { %1411 = dma.vmem_to_hbm [thread:$0]  (%p1785_p12), %s1987_s15, 256, %s1992_s14, %s1143_s11, %s1655_s19, %s1655_s19, %s1656_s9  }
 0xf2c PF: > { %p1428_p13 = scmp.ge.s32.totalorder %s1643_s30, 2  ;;  %s1171_s17 = sand.u32 1, %s1631_s27  }
 0xf2d   : > { %p2063_p3 = scmp.ne.s32.totalorder %s2052_s12, 0  ;;  %s1172_s22 = scalar_lea.sflag [#allocation4], %s1171_s17 }
 0xf2f   : > { %p1422_p7 = pnand %p1428_p13, %p2063_p3 }
 0xf31   : > { %1626 = dma.done.wait (!%p1422_p7), %s1172_s22, 256  }
 0xf32   : > { %1628 = vsyncadd (!%p1422_p7), %s1172_s22, 4294967040  ;;  %s2064_s30 = sld [smem:[#allocation11_spill]]  ;;  %s2065_s27 = smov %s1635_s28 }
 0xf33   : > { %s2066_s28 = smov %s1639_s29  ;;  %s2067_s29 = smov %s1781_s23 }
 0xf38   : > { %p22_p9 = scmp.ge.s32.totalorder %s2064_s30, 10  }
 0xf3a   :  { %24 = sbr.rel (!%p22_p9) target bundleno = 6 (0x6), region = 104 }
 0xf41   :  { %1177 = vsyncpa [#allocation3], 1 }
 0xf42   :  { %1179 = vsyncpa [#allocation3 + $0x1], 1 }
 0xf43   :  { %1180 = vsyncpa [#allocation6], 1 }
 0xf44   :  { %1181 = vsyncpa [#allocation4], 1 }
 0xf45   :  { %1183 = vsyncpa [#allocation4 + $0x1], 1 }

</bundles_post_ra>
